<compile_context>
chip_gen: v6e
topology: v6e:2x2x1
jax: 0.10.0
libtpu: 0.0.40
codegen_flags: <defaults>
</compile_context>

<pallas_src>
import functools

import jax
import jax.numpy as jnp
from jax.experimental import pallas as pl
from jax.experimental.pallas import tpu as pltpu

# Small self-test shapes (torch test uses batch=256, d_hid=512 — both work,
# just change the constants; batch % 8 == 0 and d_hid % 128 == 0 required).
BATCH = 16
D_HID = 128


def _example_code_kernel(x_ref, y_ref, p0_ref, w0_ref, b0_ref,
                         wf_ref, b1_ref, o_ref, *, compute_dtype):
    """Fused forward:
         h = relu(x @ p0 + y)
         h = relu(h @ w0 + b0)             # pipe_split() boundary: no-op
         o = relu(h @ (p1 @ w1) + b1_eff)  # mm_param1/lin1/cval fused host-side
    MXU inputs may be bf16 (compute_dtype); accumulation and all elementwise
    math (relu, +y, +bias) stay in f32 (friendly to v5e's f32-only VPU).
    """
    x = x_ref[...].astype(compute_dtype)
    h = jnp.dot(x, p0_ref[...], preferred_element_type=jnp.float32)
    h = jnp.maximum(h + y_ref[...], 0.0)

    h = jnp.dot(h.astype(compute_dtype), w0_ref[...],
                preferred_element_type=jnp.float32)
    h = jnp.maximum(h + b0_ref[...], 0.0)

    h = jnp.dot(h.astype(compute_dtype), wf_ref[...],
                preferred_element_type=jnp.float32)
    o_ref[...] = jnp.maximum(h + b1_ref[...], 0.0).astype(o_ref.dtype)


def make_params(key, d_hid):
    """Parameters in kernel-friendly layout: Linear weights already stored as
    (in_dim, out_dim) so no per-forward transpose is needed."""
    ks = jax.random.split(key, 7)
    return {
        "mm_param0": jax.random.normal(ks[0], (d_hid, d_hid), jnp.float32),
        "mm_param1": jax.random.normal(ks[1], (d_hid, d_hid), jnp.float32),
        "cval": jax.random.normal(ks[2], (d_hid,), jnp.float32),
        "lin0_w": jax.random.normal(ks[3], (d_hid, d_hid), jnp.float32) * 0.02,  # (in, out)
        "lin0_b": jax.random.normal(ks[4], (d_hid,), jnp.float32) * 0.02,
        "lin1_w": jax.random.normal(ks[5], (d_hid, d_hid), jnp.float32) * 0.02,  # (in, out)
        "lin1_b": jax.random.normal(ks[6], (d_hid,), jnp.float32) * 0.02,
    }


def prepare_kernel_params(params, *, use_bf16=False):
    """One-time host-side prep:
       * fuse mm_param1 with lin1_w into a single weight,
       * fold cval into the fused bias (b1_eff = b1 + cval @ w_fused),
       * reshape biases to (1, D) row vectors,
       * optionally cast weights to bf16 (half the weight DMA bytes, bf16-native
         MXU rate) while keeping biases in f32.
    """
    d = params["mm_param0"].shape[0]
    wdt = jnp.bfloat16 if use_bf16 else jnp.float32
    w_fused = jnp.dot(params["mm_param1"], params["lin1_w"],
                      preferred_element_type=jnp.float32)
    b1_eff = params["lin1_b"] + jnp.dot(params["cval"], w_fused,
                                        preferred_element_type=jnp.float32)
    return {
        "p0": params["mm_param0"].astype(wdt),
        "w0": params["lin0_w"].astype(wdt),
        "b0": params["lin0_b"].reshape(1, d).astype(jnp.float32),
        "w_fused": w_fused.astype(wdt),
        "b1": b1_eff.reshape(1, d).astype(jnp.float32),
    }


def example_code_forward(x, y, prep, *, use_bf16=False, batch_tile=None):
    B, D = x.shape
    assert D % 128 == 0, "d_hid must be a multiple of 128 (lane tiling)"
    assert B % 8 == 0, "batch must be a multiple of 8 (f32 sublane tiling)"
    compute_dtype = jnp.bfloat16 if use_bf16 else jnp.float32
    kernel = functools.partial(_example_code_kernel, compute_dtype=compute_dtype)
    operands = (x, y, prep["p0"], prep["w0"], prep["b0"],
                prep["w_fused"], prep["b1"])

    if batch_tile is None or batch_tile >= B:
        # Single invocation, no grid: every operand is one full VMEM block
        # (3 weight matrices + tiny activations/biases), so there is no
        # per-step pipeline overhead and the MXU sees the full batch at once.
        return pl.pallas_call(
            kernel,
            out_shape=jax.ShapeDtypeStruct((B, D), jnp.float32),
        )(*operands)

    # Large-batch path: shard rows across a 'parallel' batch axis (lets the two
    # TensorCores on v7x each take half the rows).  Weight/bias index_maps are
    # grid-invariant, so their blocks are fetched once and reused every step.
    # (pl.Buffered(1) on the invariant operands would additionally halve their
    # VMEM footprint at large d_hid; left at defaults here.)
    assert B % batch_tile == 0 and batch_tile % 8 == 0
    row_spec = pl.BlockSpec((batch_tile, D), lambda i: (i, 0))

    def full_block(a):
        return pl.BlockSpec(a.shape, lambda i: (0,) * a.ndim)

    in_specs = [row_spec, row_spec] + [full_block(a) for a in operands[2:]]
    return pl.pallas_call(
        kernel,
        out_shape=jax.ShapeDtypeStruct((B, D), jnp.float32),
        grid_spec=pltpu.PrefetchScalarGridSpec(
            num_scalar_prefetch=0,
            grid=(B // batch_tile,),
            in_specs=in_specs,
            out_specs=row_spec,
        ),
        compiler_params=pltpu.CompilerParams(
            dimension_semantics=("parallel",)),
    )(*operands)


def reference_forward(x, y, p):
    """Pure-JAX reference with the original (unfused) torch semantics."""
    h = x @ p["mm_param0"]
    h = jnp.maximum(h + y, 0.0)
    h = h @ p["lin0_w"] + p["lin0_b"]          # lin0 (weights stored (in,out))
    h = jnp.maximum(h, 0.0) + p["cval"]
    h = h @ p["mm_param1"]
    h = h @ p["lin1_w"] + p["lin1_b"]          # lin1
    return jnp.maximum(h, 0.0)


def reference_forward_prepared(x, y, prep):
    """Reference that mirrors the kernel math exactly (fused weight/bias + the
    same MXU-input dtype), used to validate the reduced-precision bf16 path."""
    cd = prep["p0"].dtype
    h = jnp.dot(x.astype(cd), prep["p0"], preferred_element_type=jnp.float32)
    h = jnp.maximum(h + y, 0.0)
    h = jnp.dot(h.astype(cd), prep["w0"], preferred_element_type=jnp.float32)
    h = jnp.maximum(h + prep["b0"], 0.0)
    h = jnp.dot(h.astype(cd), prep["w_fused"], preferred_element_type=jnp.float32)
    return jnp.maximum(h + prep["b1"], 0.0)


if __name__ == "__main__":
    key = jax.random.PRNGKey(0)
    kx, kp = jax.random.split(key, 2)
    x = jax.random.normal(kx, (BATCH, D_HID), jnp.float32)
    # torch forward's default is y = zeros(batch, d_hid)
    y = jnp.zeros((BATCH, D_HID), jnp.float32)
    params = make_params(kp, D_HID)
    ref = reference_forward(x, y, params)

    # 1) f32 MXU inputs, single invocation (default / most accurate path).
    prep_f32 = prepare_kernel_params(params, use_bf16=False)
    out = example_code_forward(x, y, prep_f32, use_bf16=False)
    jax.block_until_ready(out)
    assert out.shape == (BATCH, D_HID)
    assert jnp.allclose(out, ref, atol=2e-3, rtol=2e-3), "f32 kernel mismatch"

    # 2) bf16 MXU inputs / f32 accumulate (bf16-native MXU fast path).
    #    Validated against a reference that applies the same bf16 quantization
    #    and the same host-side fusions, so the check stays tight.
    prep_bf16 = prepare_kernel_params(params, use_bf16=True)
    out_bf16 = example_code_forward(x, y, prep_bf16, use_bf16=True)
    jax.block_until_ready(out_bf16)
    ref_bf16 = reference_forward_prepared(x, y, prep_bf16)
    assert jnp.allclose(out_bf16, ref_bf16, atol=1e-2, rtol=1e-2), "bf16 kernel mismatch"

    # 3) Gridded large-batch path (parallel batch axis), exercised at a small tile.
    out_grid = example_code_forward(x, y, prep_f32, use_bf16=False, batch_tile=8)
    jax.block_until_ready(out_grid)
    assert jnp.allclose(out_grid, ref, atol=2e-3, rtol=2e-3), "gridded kernel mismatch"

    print("KERNEL_OK")
</pallas_src>

<mosaic_0001>
module attributes {stable_mosaic.version = 11 : i64} {
  func.func @_example_code_kernel(%arg0: memref<16x128xf32, #tpu.memory_space<vmem>>, %arg1: memref<16x128xf32, #tpu.memory_space<vmem>>, %arg2: memref<128x128xf32, #tpu.memory_space<vmem>>, %arg3: memref<128x128xf32, #tpu.memory_space<vmem>>, %arg4: memref<1x128xf32, #tpu.memory_space<vmem>>, %arg5: memref<128x128xf32, #tpu.memory_space<vmem>>, %arg6: memref<1x128xf32, #tpu.memory_space<vmem>>, %arg7: memref<16x128xf32, #tpu.memory_space<vmem>>) attributes {dimension_semantics = [], scalar_prefetch = 0 : i64, scratch_operands = 0 : i64, tpu.core_type = #tpu.core_type<tc>} {
    %c0 = arith.constant 0 : index
    %c0_0 = arith.constant 0 : index
    %0 = vector.load %arg0[%c0, %c0_0] : memref<16x128xf32, #tpu.memory_space<vmem>>, vector<16x128xf32>
    %c0_1 = arith.constant 0 : index
    %c0_2 = arith.constant 0 : index
    %1 = vector.load %arg2[%c0_1, %c0_2] : memref<128x128xf32, #tpu.memory_space<vmem>>, vector<128x128xf32>
    %cst = arith.constant dense<0.000000e+00> : vector<16x128xf32>
    %2 = tpu.matmul %0, %1, %cst {dimension_numbers = #tpu.dot_dimension_numbers<[1], [0], [0], [1], [0, 0, 1, 1], [], []>} : vector<16x128xf32>, vector<128x128xf32>, vector<16x128xf32> -> vector<16x128xf32>
    %c0_3 = arith.constant 0 : index
    %c0_4 = arith.constant 0 : index
    %3 = vector.load %arg1[%c0_3, %c0_4] : memref<16x128xf32, #tpu.memory_space<vmem>>, vector<16x128xf32>
    %4 = arith.addf %2, %3 : vector<16x128xf32>
    %cst_5 = arith.constant 0.000000e+00 : f32
    %5 = vector.broadcast %cst_5 : f32 to vector<16x128xf32>
    %6 = arith.maximumf %4, %5 : vector<16x128xf32>
    %c0_6 = arith.constant 0 : index
    %c0_7 = arith.constant 0 : index
    %7 = vector.load %arg3[%c0_6, %c0_7] : memref<128x128xf32, #tpu.memory_space<vmem>>, vector<128x128xf32>
    %cst_8 = arith.constant dense<0.000000e+00> : vector<16x128xf32>
    %8 = tpu.matmul %6, %7, %cst_8 {dimension_numbers = #tpu.dot_dimension_numbers<[1], [0], [0], [1], [0, 0, 1, 1], [], []>} : vector<16x128xf32>, vector<128x128xf32>, vector<16x128xf32> -> vector<16x128xf32>
    %c0_9 = arith.constant 0 : index
    %c0_10 = arith.constant 0 : index
    %9 = vector.load %arg4[%c0_9, %c0_10] : memref<1x128xf32, #tpu.memory_space<vmem>>, vector<1x128xf32>
    %10 = vector.broadcast %9 : vector<1x128xf32> to vector<16x128xf32>
    %11 = arith.addf %8, %10 : vector<16x128xf32>
    %cst_11 = arith.constant 0.000000e+00 : f32
    %12 = vector.broadcast %cst_11 : f32 to vector<16x128xf32>
    %13 = arith.maximumf %11, %12 : vector<16x128xf32>
    %c0_12 = arith.constant 0 : index
    %c0_13 = arith.constant 0 : index
    %14 = vector.load %arg5[%c0_12, %c0_13] : memref<128x128xf32, #tpu.memory_space<vmem>>, vector<128x128xf32>
    %cst_14 = arith.constant dense<0.000000e+00> : vector<16x128xf32>
    %15 = tpu.matmul %13, %14, %cst_14 {dimension_numbers = #tpu.dot_dimension_numbers<[1], [0], [0], [1], [0, 0, 1, 1], [], []>} : vector<16x128xf32>, vector<128x128xf32>, vector<16x128xf32> -> vector<16x128xf32>
    %c0_15 = arith.constant 0 : index
    %c0_16 = arith.constant 0 : index
    %16 = vector.load %arg6[%c0_15, %c0_16] : memref<1x128xf32, #tpu.memory_space<vmem>>, vector<1x128xf32>
    %17 = vector.broadcast %16 : vector<1x128xf32> to vector<16x128xf32>
    %18 = arith.addf %15, %17 : vector<16x128xf32>
    %cst_17 = arith.constant 0.000000e+00 : f32
    %19 = vector.broadcast %cst_17 : f32 to vector<16x128xf32>
    %20 = arith.maximumf %18, %19 : vector<16x128xf32>
    %c0_18 = arith.constant 0 : index
    %c0_19 = arith.constant 0 : index
    %21 = vector.load %arg7[%c0_18, %c0_19] : memref<16x128xf32, #tpu.memory_space<vmem>>, vector<16x128xf32>
    tpu.vector_store %arg7[%c0_18, %c0_19], %20 {strides = array<i32>} : memref<16x128xf32, #tpu.memory_space<vmem>>, vector<16x128xf32>,
    return
  }
}

</mosaic_0001>

<bundles_post_ra>
// kernel: tpu_custom_call.1
= control target key start
LH: loop header
LB: loop body
LE: loop exit
PB: predicated region body
PF: predicated region fallthrough
CT: control target
= control target key end

     0   :  { %12 = vsyncpa [#allocation3], 0  ;;  %s800_s0 = inlined_call_operand.hbm [shape: f32[16,128], index: 0, kind: input, shape index: {}]   ;;  %s801_s1 = inlined_call_operand.hbm [shape: f32[16,128], index: 1, kind: input, shape index: {}]   ;;  %s802_s2 = inlined_call_operand.hbm [shape: f32[128,128], index: 2, kind: input, shape index: {}]   ;;  %s803_s3 = inlined_call_operand.hbm [shape: f32[128,128], index: 3, kind: input, shape index: {}]   ;;  %s804_s4 = inlined_call_operand.vmem [shape: f32[1,128], index: 4, kind: input, shape index: {}]   ;;  %s805_s5 = inlined_call_operand.hbm [shape: f32[128,128], index: 5, kind: input, shape index: {}]   ;;  %s806_s6 = inlined_call_operand.vmem [shape: f32[1,128], index: 6, kind: input, shape index: {}]   ;;  %s807_s7 = inlined_call_operand.hbm [shape: f32[16,128], index: 7, kind: output, shape index: {}]  }
   0x1   :  { %13 = vsyncpa [#allocation6], 0 }
   0x2   :  { %14 = vsyncpa [#allocation9], 0 }
   0x3   :  { %15 = vsyncpa [#allocation4], 0  ;;  %s710_s24 = smov [#allocation5]   ;;  %s711_s26 = smov [#allocation8]  }
   0x4   :  { %s33_s25 = sshll.u32 %s710_s24, 4  ;;  %s57_s27 = sshll.u32 %s711_s26, 4  ;;  %s34_s25 = int_to_ptr.vmem [resolvable:$true] %s33_s25  ;;  %s58_s27 = int_to_ptr.vmem [resolvable:$true] %s57_s27 }
   0x5   :  { %s590_s28 = scalar_lea.vmem %s34_s25, 256  ;;  %p595_p1 = scmp.lt.s32.totalorder %s34_s25, %s34_s25 }
   0x6   :  { %p591_p0 = scmp.ne.s32.totalorder %s34_s25, %s590_s28  ;;  %p596_p2 = scmp.lt.s32.totalorder %s590_s28, %s590_s28 }
   0x8   :  { %p597_p3 = por %p596_p2, %p595_p1 }
   0xa   :  { %p598_p4 = pnand %p597_p3, %p591_p0 }
   0xc   :  { %601 = shalt.err (!%p598_p4)
}
   0xd   :  { %s712_s29 = smov 128   ;;  %s713_s30 = smov 8  }
   0xe   :  { %39 = dma.hbm_to_vmem [thread:$0]  %s801_s1, 256, %s34_s25, [#allocation6], %s712_s29, %s712_s29, %s713_s30  }
   0xf   :  { %s610_s10 = scalar_lea.vmem %s58_s27, 2048  ;;  %p615_p6 = scmp.lt.s32.totalorder %s58_s27, %s58_s27 }
  0x10   :  { %p611_p5 = scmp.ne.s32.totalorder %s58_s27, %s610_s10  ;;  %p616_p7 = scmp.lt.s32.totalorder %s610_s10, %s610_s10 }
  0x12   :  { %p617_p8 = por %p616_p7, %p615_p6 }
  0x14   :  { %p618_p9 = pnand %p617_p8, %p611_p5 }
  0x16   :  { %621 = shalt.err (!%p618_p9)
}
  0x17   :  { %63 = dma.hbm_to_vmem [thread:$0]  %s803_s3, 2048, %s58_s27, [#allocation9], %s712_s29, %s712_s29, %s713_s30  }
  0x18   :  { %s714_s13 = smov [#allocation2]   ;;  %s715_s15 = smov [#allocation7]  }
  0x19   :  { %s21_s14 = sshll.u32 %s714_s13, 4  ;;  %s45_s16 = sshll.u32 %s715_s15, 4  ;;  %s22_s14 = int_to_ptr.vmem [resolvable:$true] %s21_s14  ;;  %s46_s16 = int_to_ptr.vmem [resolvable:$true] %s45_s16 }
  0x1a   :  { %s630_s1 = scalar_lea.vmem %s22_s14, 256  ;;  %p635_p11 = scmp.lt.s32.totalorder %s22_s14, %s22_s14 }
  0x1b   :  { %p631_p10 = scmp.ne.s32.totalorder %s22_s14, %s630_s1  ;;  %p636_p12 = scmp.lt.s32.totalorder %s630_s1, %s630_s1 }
  0x1d   :  { %p637_p13 = por %p636_p12, %p635_p11 }
  0x1f   :  { %p638_p0 = pnand %p637_p13, %p631_p10 }
  0x21   :  { %641 = shalt.err (!%p638_p0)
}
  0x22   :  { %27 = dma.hbm_to_vmem [thread:$0]  %s800_s0, 256, %s22_s14, [#allocation3], %s712_s29, %s712_s29, %s713_s30  }
  0x23   :  { %s650_s3 = scalar_lea.vmem %s46_s16, 2048  ;;  %p655_p2 = scmp.lt.s32.totalorder %s46_s16, %s46_s16 }
  0x24   :  { %p651_p1 = scmp.ne.s32.totalorder %s46_s16, %s650_s3  ;;  %p656_p3 = scmp.lt.s32.totalorder %s650_s3, %s650_s3 }
  0x26   :  { %p657_p4 = por %p656_p3, %p655_p2 }
  0x28   :  { %p658_p5 = pnand %p657_p4, %p651_p1 }
  0x2a   :  { %661 = shalt.err (!%p658_p5)
}
  0x2b   :  { %51 = dma.hbm_to_vmem [thread:$0]  %s802_s2, 2048, %s46_s16, [#allocation6], %s712_s29, %s712_s29, %s713_s30  }
  0x2c   :  { %s716_s21 = smov [#allocation10]  }
  0x2d   :  { %s71_s22 = sshll.u32 %s716_s21, 4  ;;  %s72_s22 = int_to_ptr.vmem [resolvable:$true] %s71_s22 }
  0x2e   :  { %s670_s23 = scalar_lea.vmem %s72_s22, 2048  ;;  %p675_p7 = scmp.lt.s32.totalorder %s72_s22, %s72_s22 }
  0x2f   :  { %p671_p6 = scmp.ne.s32.totalorder %s72_s22, %s670_s23  ;;  %p676_p8 = scmp.lt.s32.totalorder %s670_s23, %s670_s23 }
  0x31   :  { %p677_p9 = por %p676_p8, %p675_p7 }
  0x33   :  { %p678_p10 = pnand %p677_p9, %p671_p6 }
  0x35   :  { %681 = shalt.err (!%p678_p10)
}
  0x36   :  { %77 = dma.hbm_to_vmem [thread:$0]  %s805_s5, 2048, %s72_s22, [#allocation9], %s712_s29, %s712_s29, %s713_s30  }
  0x37   :  { %702 = dma.done.wait [#allocation3], 256  }
  0x38   :  { %703 = vsyncadd [#allocation3], 4294967040 }
  0x39   :  { %704 = dma.done.wait [#allocation6], 2304  }
  0x3a   :  { %705 = vsyncadd [#allocation6], 4294964992 }
  0x3b   :  { %706 = dma.done.wait [#allocation9], 4096  }
  0x3c   :  { %707 = vsyncadd [#allocation9], 4294963200  ;;  %v112_v0 = vld [vmem:[#allocation7 + $0x78] sm:$0xff]  ;;  %v111_v1 = vld [vmem:[#allocation7 + $0x70] sm:$0xff]  ;;  %s717_s27 = smov [#allocation11]  }
  0x3d   :  { %469 = vmatprep.subr.mxu0 %v112_v0  ;;  %v110_v2 = vld [vmem:[#allocation7 + $0x68] sm:$0xff]  ;;  %v109_v3 = vld [vmem:[#allocation7 + $0x60] sm:$0xff]  ;;  %v108_v5 = vld [vmem:[#allocation7 + $0x58] sm:$0xff]  ;;  %s399_s28 = sshll.u32 %s717_s27, 4  ;;  %s400_s28 = int_to_ptr.vmem [resolvable:$true] %s399_s28 }
  0x3e   :  { %470 = vmatpush3.msra.mxu0 %v112_v0  ;;  %v95_v4 = vld [vmem:[#allocation2] sm:$0xff]  ;;  %v207_v6 = vld [vmem:[#allocation8 + $0x78] sm:$0xff]  ;;  %v206_v7 = vld [vmem:[#allocation8 + $0x70] sm:$0xff]  ;;  %p687_p12 = scmp.lt.s32.totalorder %s400_s28, %s400_s28 }
  0x3f   :  { %471 = vmatprep.subr.mxu0 %v111_v1  ;;  %501 = vmatprep.mubr.f32.mxu0 %v95_v4  ;;  %v107_v8 = vld [vmem:[#allocation7 + $0x50] sm:$0xff]  ;;  %v205_v9 = vld [vmem:[#allocation8 + $0x68] sm:$0xff]  ;;  %v204_v11 = vld [vmem:[#allocation8 + $0x60] sm:$0xff] }
  0x40   :  { %472 = vmatpush3.msra.mxu0 %v111_v1  ;;  %504 = vmatprep.subr.mxu1 %v207_v6  ;;  %v106_v10 = vld [vmem:[#allocation7 + $0x48] sm:$0xff]  ;;  %v105_v12 = vld [vmem:[#allocation7 + $0x40] sm:$0xff]  ;;  %v203_v13 = vld [vmem:[#allocation8 + $0x58] sm:$0xff] }
  0x41   :  { %473 = vmatprep.subr.mxu0 %v110_v2  ;;  %505 = vmatpush3.msra.mxu1 %v207_v6  ;;  %v104_v14 = vld [vmem:[#allocation7 + $0x38] sm:$0xff]  ;;  %v202_v15 = vld [vmem:[#allocation8 + $0x50] sm:$0xff]  ;;  %v201_v17 = vld [vmem:[#allocation8 + $0x48] sm:$0xff] }
  0x42   :  { %474 = vmatpush3.msra.mxu0 %v110_v2  ;;  %506 = vmatprep.subr.mxu1 %v206_v7  ;;  %v103_v16 = vld [vmem:[#allocation7 + $0x30] sm:$0xff]  ;;  %v102_v18 = vld [vmem:[#allocation7 + $0x28] sm:$0xff]  ;;  %v200_v19 = vld [vmem:[#allocation8 + $0x40] sm:$0xff] }
  0x43   :  { %475 = vmatprep.subr.mxu0 %v109_v3  ;;  %507 = vmatpush3.msra.mxu1 %v206_v7  ;;  %v101_v20 = vld [vmem:[#allocation7 + $0x20] sm:$0xff]  ;;  %v199_v21 = vld [vmem:[#allocation8 + $0x38] sm:$0xff]  ;;  %v198_v23 = vld [vmem:[#allocation8 + $0x30] sm:$0xff] }
  0x44   :  { %476 = vmatpush3.msra.mxu0 %v109_v3  ;;  %508 = vmatprep.subr.mxu1 %v205_v9  ;;  %v100_v22 = vld [vmem:[#allocation7 + $0x18] sm:$0xff]  ;;  %v99_v24 = vld [vmem:[#allocation7 + $0x10] sm:$0xff]  ;;  %v197_v25 = vld [vmem:[#allocation8 + $0x28] sm:$0xff] }
  0x45   :  { %477 = vmatprep.subr.mxu0 %v108_v5  ;;  %509 = vmatpush3.msra.mxu1 %v205_v9  ;;  %v98_v26 = vld [vmem:[#allocation7 + $0x8] sm:$0xff]  ;;  %v196_v27 = vld [vmem:[#allocation8 + $0x20] sm:$0xff]  ;;  %v195_v30 = vld [vmem:[#allocation8 + $0x18] sm:$0xff] }
  0x46   :  { %478 = vmatpush3.msra.mxu0 %v108_v5  ;;  %510 = vmatprep.subr.mxu1 %v204_v11  ;;  %v97_v28 = vld [vmem:[#allocation7] sm:$0xff]  ;;  %v96_v29 = vld [vmem:[#allocation2 + $0x8] sm:$0xff]  ;;  %v194_v31 = vld [vmem:[#allocation8 + $0x10] sm:$0xff] }
  0x47   :  { %479 = vmatprep.subr.mxu0 %v107_v8  ;;  %511 = vmatpush3.msra.mxu1 %v204_v11  ;;  %v193_v32 = vld [vmem:[#allocation8 + $0x8] sm:$0xff]  ;;  %v192_v33 = vld [vmem:[#allocation8] sm:$0xff]  ;;  %v307_v34 = vld [vmem:[#allocation10 + $0x78] sm:$0xff] }
  0x48   :  { %480 = vmatpush3.msra.mxu0 %v107_v8  ;;  %512 = vmatprep.subr.mxu1 %v203_v13  ;;  %v306_v35 = vld [vmem:[#allocation10 + $0x70] sm:$0xff]  ;;  %v305_v36 = vld [vmem:[#allocation10 + $0x68] sm:$0xff]  ;;  %v304_v37 = vld [vmem:[#allocation10 + $0x60] sm:$0xff] }
  0x49   :  { %481 = vmatprep.subr.mxu0 %v106_v10  ;;  %513 = vmatpush3.msra.mxu1 %v203_v13  ;;  %v303_v38 = vld [vmem:[#allocation10 + $0x58] sm:$0xff]  ;;  %v302_v39 = vld [vmem:[#allocation10 + $0x50] sm:$0xff]  ;;  %v301_v40 = vld [vmem:[#allocation10 + $0x48] sm:$0xff] }
  0x4a   :  { %482 = vmatpush3.msra.mxu0 %v106_v10  ;;  %514 = vmatprep.subr.mxu1 %v202_v15  ;;  %v300_v41 = vld [vmem:[#allocation10 + $0x40] sm:$0xff]  ;;  %v299_v42 = vld [vmem:[#allocation10 + $0x38] sm:$0xff]  ;;  %v298_v43 = vld [vmem:[#allocation10 + $0x30] sm:$0xff] }
  0x4b   :  { %483 = vmatprep.subr.mxu0 %v105_v12  ;;  %515 = vmatpush3.msra.mxu1 %v202_v15  ;;  %v297_v44 = vld [vmem:[#allocation10 + $0x28] sm:$0xff]  ;;  %v296_v45 = vld [vmem:[#allocation10 + $0x20] sm:$0xff]  ;;  %v114_v46 = vld [vmem:[#allocation5 + $0x8] sm:$0xff] }
  0x4c   :  { %484 = vmatpush3.msra.mxu0 %v105_v12  ;;  %516 = vmatprep.subr.mxu1 %v201_v17  ;;  %v113_v48 = vld [vmem:[#allocation5] sm:$0xff]  ;;  %v295_v54 = vld [vmem:[#allocation10 + $0x18] sm:$0xff]  ;;  %v293_v56 = vld [vmem:[#allocation10 + $0x8] sm:$0xff] }
  0x4d   :  { %485 = vmatprep.subr.mxu0 %v104_v14  ;;  %517 = vmatpush3.msra.mxu1 %v201_v17  ;;  %v294_v55 = vld [vmem:[#allocation10 + $0x10] sm:$0xff]  ;;  %v292_v57 = vld [vmem:[#allocation10] sm:$0xff] }
  0x4e   :  { %486 = vmatpush3.msra.mxu0 %v104_v14  ;;  %518 = vmatprep.subr.mxu1 %v200_v19  ;;  %v413_v58 = vld [vmem:[%s804_s4] ss:$0 sm:$0xff]  ;;  %s682_s4 = scalar_lea.vmem %s400_s28, 256 }
  0x4f   :  { %487 = vmatprep.subr.mxu0 %v103_v16  ;;  %519 = vmatpush3.msra.mxu1 %v200_v19  ;;  %v414_v1 = vld [vmem:[%s806_s6] ss:$0 sm:$0xff]  ;;  %p683_p11 = scmp.ne.s32.totalorder %s400_s28, %s682_s4  ;;  %p688_p13 = scmp.lt.s32.totalorder %s682_s4, %s682_s4 }
  0x50   :  { %488 = vmatpush3.msra.mxu0 %v103_v16  ;;  %520 = vmatprep.subr.mxu1 %v199_v21 }
  0x51   :  { %489 = vmatprep.subr.mxu0 %v102_v18  ;;  %521 = vmatpush3.msra.mxu1 %v199_v21  ;;  %p689_p0 = por %p688_p13, %p687_p12 }
  0x52   :  { %490 = vmatpush3.msra.mxu0 %v102_v18  ;;  %522 = vmatprep.subr.mxu1 %v198_v23 }
  0x53   :  { %491 = vmatprep.subr.mxu0 %v101_v20  ;;  %523 = vmatpush3.msra.mxu1 %v198_v23  ;;  %p690_p1 = pnand %p689_p0, %p683_p11 }
  0x54   :  { %492 = vmatpush3.msra.mxu0 %v101_v20  ;;  %524 = vmatprep.subr.mxu1 %v197_v25 }
  0x55   :  { %493 = vmatprep.subr.mxu0 %v100_v22  ;;  %525 = vmatpush3.msra.mxu1 %v197_v25 }
  0x56   :  { %494 = vmatpush3.msra.mxu0 %v100_v22  ;;  %526 = vmatprep.subr.mxu1 %v196_v27 }
  0x57   :  { %495 = vmatprep.subr.mxu0 %v99_v24  ;;  %527 = vmatpush3.msra.mxu1 %v196_v27 }
  0x58   :  { %496 = vmatpush3.msra.mxu0 %v99_v24  ;;  %528 = vmatprep.subr.mxu1 %v195_v30 }
  0x59   :  { %497 = vmatprep.subr.mxu0 %v98_v26  ;;  %529 = vmatpush3.msra.mxu1 %v195_v30 }
  0x5a   :  { %498 = vmatpush3.msra.mxu0 %v98_v26  ;;  %530 = vmatprep.subr.mxu1 %v194_v31 }
  0x5b   :  { %499 = vmatprep.subr.mxu0 %v97_v28  ;;  %531 = vmatpush3.msra.mxu1 %v194_v31 }
  0x5c   :  { %500 = vmatpush3.msra.mxu0 %v97_v28  ;;  %532 = vmatprep.subr.mxu1 %v193_v32 }
  0x5d   :  { %502 = vmatmul.mubr.f32.vlgmr.msra.gmra.mxu0 %v96_v29  ;;  %533 = vmatpush3.msra.mxu1 %v193_v32 }
  0x5e   :  { %534 = vmatprep.subr.mxu1 %v192_v33  ;;  %539 = vmatprep.subr.mxu0 %v307_v34 }
  0x5f   :  { %535 = vmatpush3.msra.mxu1 %v192_v33  ;;  %540 = vmatpush3.msra.mxu0 %v307_v34 }
  0x60   :  { %541 = vmatprep.subr.mxu0 %v306_v35 }
  0x61   :  { %542 = vmatpush3.msra.mxu0 %v306_v35 }
  0x62   :  { %543 = vmatprep.subr.mxu0 %v305_v36 }
  0x63   :  { %544 = vmatpush3.msra.mxu0 %v305_v36 }
  0x64   :  { %545 = vmatprep.subr.mxu0 %v304_v37 }
  0x65   :  { %546 = vmatpush3.msra.mxu0 %v304_v37 }
  0x66   :  { %547 = vmatprep.subr.mxu0 %v303_v38 }
  0x67   :  { %548 = vmatpush3.msra.mxu0 %v303_v38 }
  0x68   :  { %549 = vmatprep.subr.mxu0 %v302_v39 }
  0x69   :  { %550 = vmatpush3.msra.mxu0 %v302_v39 }
  0x6a   :  { %551 = vmatprep.subr.mxu0 %v301_v40 }
  0x6b   :  { %552 = vmatpush3.msra.mxu0 %v301_v40 }
  0x6c   :  { %553 = vmatprep.subr.mxu0 %v300_v41 }
  0x6d   :  { %554 = vmatpush3.msra.mxu0 %v300_v41 }
  0x6e   :  { %555 = vmatprep.subr.mxu0 %v299_v42 }
  0x6f   :  { %556 = vmatpush3.msra.mxu0 %v299_v42 }
  0x70   :  { %557 = vmatprep.subr.mxu0 %v298_v43 }
  0x71   :  { %558 = vmatpush3.msra.mxu0 %v298_v43 }
  0x72   :  { %559 = vmatprep.subr.mxu0 %v297_v44 }
  0x73   :  { %560 = vmatpush3.msra.mxu0 %v297_v44 }
  0x74   :  { %561 = vmatprep.subr.mxu0 %v296_v45 }
  0x75   :  { %562 = vmatpush3.msra.mxu0 %v296_v45 }
  0x76   :  { %563 = vmatprep.subr.mxu0 %v295_v54 }
  0x77   :  { %564 = vmatpush3.msra.mxu0 %v295_v54 }
  0x78   :  { %565 = vmatprep.subr.mxu0 %v294_v55 }
  0x79   :  { %566 = vmatpush3.msra.mxu0 %v294_v55 }
  0x7a   :  { %567 = vmatprep.subr.mxu0 %v293_v56 }
  0x7b   :  { %568 = vmatpush3.msra.mxu0 %v293_v56 }
  0x7c   :  { %569 = vmatprep.subr.mxu0 %v292_v57 }
  0x7d   :  { %570 = vmatpush3.msra.mxu0 %v292_v57 }
 0x11d   :  { %v503_v47 = vpop.f32.mrf.mxu0 }
 0x11e   :  { %v187_v49 = vadd.f32 %v503_v47, %v114_v46 }
 0x11f   :  { %v181_v50 = vpop.f32.mrf.mxu0 }
 0x120   :  { %v182_v51 = vadd.f32 %v181_v50, %v113_v48  ;;  %v191_v53 = vmax.f32 %v187_v49, 0.0 }
 0x122   :  { %v190_v52 = vmax.f32 %v182_v51, 0.0 }
 0x124   :  { %536 = vmatprep.mubr.f32.mxu1 %v190_v52 }
 0x125   :  { %537 = vmatmul.mubr.f32.vlgmr.msra.gmra.mxu1 %v191_v53 }
 0x1e5   :  { %v538_v59 = vpop.f32.mrf.mxu1 }
 0x1e6   :  { %v287_v60 = vadd.f32 %v538_v59, %v413_v58 }
 0x1e7   :  { %v281_v61 = vpop.f32.mrf.mxu1 }
 0x1e8   :  { %v282_v62 = vadd.f32 %v413_v58, %v281_v61  ;;  %v291_v0 = vmax.f32 %v287_v60, 0.0 }
 0x1ea   :  { %v290_v63 = vmax.f32 %v282_v62, 0.0 }
 0x1ec   :  { %571 = vmatprep.mubr.f32.mxu0 %v290_v63 }
 0x1ed   :  { %572 = vmatmul.mubr.f32.vlgmr.msra.gmra.mxu0 %v291_v0 }
 0x2ad   :  { %v573_v2 = vpop.f32.mrf.mxu0 }
 0x2ae   :  { %v387_v3 = vadd.f32 %v573_v2, %v414_v1 }
 0x2af   :  { %v381_v4 = vpop.f32.mrf.mxu0 }
 0x2b0   :  { %v391_v5 = vmax.f32 %v387_v3, 0.0  ;;  %v382_v6 = vadd.f32 %v414_v1, %v381_v4 }
 0x2b2   :  { %393 = vst [vmem:[#allocation11 + $0x8] sm:$0xff] %v391_v5  ;;  %v390_v7 = vmax.f32 %v382_v6, 0.0 }
 0x2b4   :  { %392 = vst [vmem:[#allocation11] sm:$0xff] %v390_v7 }
 0x2b5   :  { %693 = shalt.err (!%p690_p1)
}
 0x2b6   :  { %405 = dma.vmem_to_hbm [thread:$0]  %s400_s28, 256, %s807_s7, [#allocation4], %s712_s29, %s712_s29, %s713_s30  }
 0x2b7   :  { %708 = dma.done.wait [#allocation4], 256  }
 0x2b8   :  { %709 = vsyncadd [#allocation4], 4294967040 }
 0x2b9   :  { %409 = vsyncpa [#allocation3], 1 }
 0x2ba   :  { %410 = vsyncpa [#allocation6], 1 }
 0x2bb   :  { %411 = vsyncpa [#allocation9], 1 }
 0x2bc   :  { %412 = vsyncpa [#allocation4], 1 }

</bundles_post_ra>
